<compile_context>
chip_gen: v5e
topology: v5e:2x2
jax: 0.10.0
libtpu: 0.0.40
codegen_flags: <defaults>
</compile_context>

<pallas_src>
import functools

import jax
import jax.numpy as jnp
from jax.experimental import pallas as pl
from jax.experimental.pallas import tpu as pltpu


# ----------------------------------------------------------------------------
# Fused kernel: both towers + feature heads + final heads + loss, one call.
# ----------------------------------------------------------------------------
def _fusion_kernel(x_ref, aux_ref, p_ref, out_ref, *,
                   offs, d_in, two_f, q, lambda_dis, weight_mode, gce_mode):
    o_w1, o_b1, o_wf, o_bf, o_wfin, o_bfin = offs
    mm_dtype = p_ref.dtype

    # Static, sublane-aligned slices of the packed parameter slab.
    w1 = p_ref[o_w1:o_w1 + d_in, :]
    b1 = p_ref[o_b1:o_b1 + 1, :].astype(jnp.float32)
    wf = p_ref[o_wf:o_wf + two_f, :]
    bf = p_ref[o_bf:o_bf + 1, :].astype(jnp.float32)
    wfin = p_ref[o_wfin:o_wfin + two_f, :]
    bfin = p_ref[o_bfin:o_bfin + 1, :].astype(jnp.float32)

    # Layer 1 of BOTH towers: a single K=d_in MXU push.
    # (B, 2F) = [scores_c | scores_b]
    scores = jnp.maximum(
        jnp.dot(x_ref[...], w1, preferred_element_type=jnp.float32) + b1, 0.0)

    # Feature heads (z_c == z_b == scores in the forward pass; detach = identity).
    feat = jnp.maximum(
        jnp.dot(scores.astype(mm_dtype), wf,
                preferred_element_type=jnp.float32) + bf, 0.0)   # (B, 2F)

    # Final heads: Wfin block-diagonal, lane-padded to 2F -> lane-dense result.
    # col 0 = scores_c1, col 1 = scores_b1, cols >= 2 are exactly 0.
    s1 = jnp.dot(feat.astype(mm_dtype), wfin,
                 preferred_element_type=jnp.float32) + bfin       # (B, 2F)

    aux = aux_ref[...]                      # (B, 4) = [labels | ltb | lab | lvb]
    labels = aux[:, 0:1]
    l_all = jnp.abs(s1 - labels)            # one VALU op on the whole slab
    loss_c = l_all[:, 0:1]                  # L1(scores_c1, labels)
    loss_b = l_all[:, 1:2]                  # L1(scores_b1, labels)

    if weight_mode == "avg":
        agg = (aux[:, 1:2] + aux[:, 2:3] + aux[:, 3:4] + loss_b) * 0.25
        lw = agg * pl.reciprocal(agg + loss_c + 1e-8, approx=True)   # EUP, not VALU
        loss_dis_conflict = loss_c * lw
    elif weight_mode == "min":
        agg = jnp.minimum(jnp.minimum(aux[:, 1:2], loss_b),
                          jnp.minimum(aux[:, 2:3], aux[:, 3:4]))
        lw = agg * pl.reciprocal(agg + loss_c + 1e-8, approx=True)
        loss_dis_conflict = loss_c * lw
    else:
        loss_dis_conflict = loss_c

    if gce_mode == "tanh":
        # safe 1/x preserving the tanh(inf) == 1 limit; EUP reciprocal.
        inv = pl.reciprocal(jnp.maximum(loss_b, 1e-30), approx=True)
        loss_dis_align = jnp.tanh(inv ** q) * loss_b
    elif gce_mode == "sigmoid":
        loss_dis_align = 2.0 * jax.nn.sigmoid(-loss_b) * loss_b
    else:
        loss_dis_align = jnp.zeros_like(loss_b)

    # epoch <= swap_epochs => lambda_swap == 0, so loss == loss_dis.
    # mean(a) + l*mean(b) == mean(a + l*b): one cross-sublane reduction.
    loss = jnp.mean(loss_dis_conflict + lambda_dis * loss_dis_align,
                    keepdims=True)                                   # (1, 1)

    # Fold the scalar loss into lane 2 of the lane-dense output slab.
    lane = jax.lax.broadcasted_iota(jnp.int32, s1.shape, 1)
    out_ref[...] = jnp.where(lane == 2, jnp.broadcast_to(loss, s1.shape), s1)


# ----------------------------------------------------------------------------
# Wrapper
# ----------------------------------------------------------------------------
def fusion_forward(text, audio, video, labels,
                   loss_text_b, loss_audio_b, loss_video_b, packed,
                   *, q, lambda_dis, weight_mode="avg", gce_mode="tanh",
                   compute_dtype=jnp.float32):
    B = text.shape[0]
    d_in = packed["d_in"]
    two_f = packed["two_f"]
    assert two_f >= 3, "output slab needs >= 3 lanes (scores_c1, scores_b1, loss)"

    # torch.cat([text, audio, video], dim=-1): one cheap XLA concat so the
    # kernel runs a single K=d_in matmul.
    fusion_h = jnp.concatenate([text, audio, video], axis=-1).astype(compute_dtype)
    # Per-sample scalars packed into one operand: [labels | ltb | lab | lvb].
    aux = jnp.concatenate(
        [labels, loss_text_b, loss_audio_b, loss_video_b], axis=-1
    ).astype(jnp.float32)
    slab = packed["slab"].astype(compute_dtype)

    itemsize = jnp.dtype(compute_dtype).itemsize
    cost = pl.CostEstimate(
        flops=2 * B * (d_in * two_f + 2 * two_f * two_f),
        transcendentals=4 * B,
        bytes_accessed=(B * d_in + slab.shape[0] * two_f) * itemsize
                       + (B * 4 + B * two_f) * 4,
    )

    kern = functools.partial(
        _fusion_kernel, offs=packed["offsets"], d_in=d_in, two_f=two_f,
        q=q, lambda_dis=lambda_dis, weight_mode=weight_mode, gce_mode=gce_mode)

    out = pl.pallas_call(
        kern,
        out_shape=jax.ShapeDtypeStruct((B, two_f), jnp.float32),
        in_specs=[pl.BlockSpec(memory_space=pltpu.MemorySpace.VMEM)] * 3,
        out_specs=pl.BlockSpec(memory_space=pltpu.MemorySpace.VMEM),
        cost_estimate=cost,
    )(fusion_h, aux, slab)

    loss = out[0, 2]
    scores_c1 = out[:, 0:1]
    return loss, scores_c1


# ----------------------------------------------------------------------------
# Parameter construction (PyTorch layout), tower fusion and slab packing.
# ----------------------------------------------------------------------------
def init_tower_params(key, d_in, fusion_dim):
    ks = jax.random.split(key, 6)
    scale = 0.1

    def rn(k, shape):
        return (scale * jax.random.normal(k, shape)).astype(jnp.float32)

    return dict(
        w1=rn(ks[0], (d_in, fusion_dim)),            # model_* Linear (W^T)
        b1=rn(ks[1], (1, fusion_dim)),
        wf=rn(ks[2], (2 * fusion_dim, fusion_dim)),  # model_*_feature Linear (W^T)
        bf=rn(ks[3], (1, fusion_dim)),
        wfin=rn(ks[4], (fusion_dim, 1)),             # model_*_final Linear (W^T)
        bfin=rn(ks[5], (1, 1)),
    )


def _round_up8(n):
    return -(-n // 8) * 8


def pack_params(pc, pb, d_text, d_audio, d_video):
    """Fuse tower-c / tower-b weights and pack everything into ONE fp32 slab.

    Row layout (each segment starts at a sublane-aligned offset so the static
    in-kernel slices are cheap views):
        [ W1 | b1 | Wf | bf | Wfin(pad) | bfin(pad) ]   width = 2F lanes
    """
    F = pc["wfin"].shape[0]
    two_f = 2 * F
    d_in = d_text + d_audio + d_video

    W1 = jnp.concatenate([pc["w1"], pb["w1"]], axis=1)           # (d_in, 2F)
    b1 = jnp.concatenate([pc["b1"], pb["b1"]], axis=1)           # (1, 2F)
    Wf = jnp.concatenate([pc["wf"], pb["wf"]], axis=1)           # (2F, 2F)
    bf = jnp.concatenate([pc["bf"], pb["bf"]], axis=1)           # (1, 2F)
    Wfin = jnp.zeros((two_f, two_f), jnp.float32)                # block-diag, lane padded
    Wfin = Wfin.at[:F, 0:1].set(pc["wfin"]).at[F:, 1:2].set(pb["wfin"])
    bfin = jnp.zeros((1, two_f), jnp.float32)
    bfin = bfin.at[:, 0:1].set(pc["bfin"]).at[:, 1:2].set(pb["bfin"])

    segs = [W1, b1, Wf, bf, Wfin, bfin]
    offsets, rows = [], 0
    for s in segs:
        offsets.append(rows)
        rows += _round_up8(s.shape[0])
    slab = jnp.zeros((rows, two_f), jnp.float32)
    for off, s in zip(offsets, segs):
        slab = slab.at[off:off + s.shape[0], :].set(s)
    return dict(slab=slab, offsets=tuple(offsets), d_in=d_in, two_f=two_f)


# ----------------------------------------------------------------------------
# Pure-JAX reference (mirrors the PyTorch forward, epoch <= swap_epochs path).
# ----------------------------------------------------------------------------
def fusion_forward_ref(text, audio, video, labels, ltb, lab, lvb, pc, pb,
                       q, lambda_dis, weight_mode, gce_mode):
    fusion_h = jnp.concatenate([text, audio, video], axis=-1)
    sc = jax.nn.relu(fusion_h @ pc["w1"] + pc["b1"])
    sb = jax.nn.relu(fusion_h @ pb["w1"] + pb["b1"])
    z = jnp.concatenate([sc, sb], axis=1)
    fc = jax.nn.relu(z @ pc["wf"] + pc["bf"])
    fb = jax.nn.relu(z @ pb["wf"] + pb["bf"])
    sc1 = fc @ pc["wfin"] + pc["bfin"]
    sb1 = fb @ pb["wfin"] + pb["bfin"]
    loss_c = jnp.abs(sc1 - labels)
    loss_b = jnp.abs(sb1 - labels)
    if weight_mode == "avg":
        agg = (ltb + lab + lvb + loss_b) / 4.0
        ldc = loss_c * (agg / (agg + loss_c + 1e-8))
    elif weight_mode == "min":
        agg = jnp.minimum(jnp.minimum(ltb, loss_b), jnp.minimum(lab, lvb))
        ldc = loss_c * (agg / (agg + loss_c + 1e-8))
    else:
        ldc = loss_c
    if gce_mode == "tanh":
        lda = jnp.tanh((1.0 / loss_b) ** q) * loss_b
    elif gce_mode == "sigmoid":
        lda = 2.0 * jax.nn.sigmoid(-loss_b) * loss_b
    else:
        lda = jnp.zeros_like(loss_b)
    loss = jnp.mean(ldc) + lambda_dis * jnp.mean(lda)
    return loss, sc1


if __name__ == "__main__":
    # args: post_text_dim = post_audio_dim = post_video_dim = 32,
    #       post_fusion_dim = 32, weight='avg', gce='tanh', q=0.7,
    #       lambda_dis=1.0, epoch=0 (<= swap_epochs -> no swap branch)
    B = 8
    D_TEXT, D_AUDIO, D_VIDEO = 32, 32, 32
    FUSION = 32
    Q, LAMBDA_DIS = 0.7, 1.0
    WEIGHT_MODE, GCE_MODE = "avg", "tanh"

    key = jax.random.PRNGKey(0)
    k_t, k_a, k_v, k_lab, k_lt, k_la, k_lv, k_pc, k_pb = jax.random.split(key, 9)

    text = jax.random.normal(k_t, (B, D_TEXT), dtype=jnp.float32)
    audio = jax.random.normal(k_a, (B, D_AUDIO), dtype=jnp.float32)
    video = jax.random.normal(k_v, (B, D_VIDEO), dtype=jnp.float32)
    labels = jax.random.normal(k_lab, (B, 1), dtype=jnp.float32)
    loss_text_b = jnp.abs(jax.random.normal(k_lt, (B, 1), dtype=jnp.float32))
    loss_audio_b = jnp.abs(jax.random.normal(k_la, (B, 1), dtype=jnp.float32))
    loss_video_b = jnp.abs(jax.random.normal(k_lv, (B, 1), dtype=jnp.float32))

    params_c = init_tower_params(k_pc, D_TEXT + D_AUDIO + D_VIDEO, FUSION)
    params_b = init_tower_params(k_pb, D_TEXT + D_AUDIO + D_VIDEO, FUSION)
    packed = pack_params(params_c, params_b, D_TEXT, D_AUDIO, D_VIDEO)

    loss, scores_c1 = fusion_forward(
        text, audio, video, labels, loss_text_b, loss_audio_b, loss_video_b,
        packed, q=Q, lambda_dis=LAMBDA_DIS,
        weight_mode=WEIGHT_MODE, gce_mode=GCE_MODE,
        compute_dtype=jnp.float32)   # bf16 on v6e/v7x for bandwidth if desired
    jax.block_until_ready((loss, scores_c1))

    ref_loss, ref_sc1 = fusion_forward_ref(
        text, audio, video, labels, loss_text_b, loss_audio_b, loss_video_b,
        params_c, params_b, Q, LAMBDA_DIS, WEIGHT_MODE, GCE_MODE)

    # Loss tolerance slightly widened to cover the EUP approx-reciprocal path.
    assert jnp.allclose(loss, ref_loss, atol=5e-3, rtol=5e-3), (loss, ref_loss)
    assert jnp.allclose(scores_c1, ref_sc1, atol=1e-3, rtol=1e-3)

    print("KERNEL_OK")
</pallas_src>

<mosaic_0001>
module attributes {stable_mosaic.version = 11 : i64} {
  func.func @_fusion_kernel(%arg0: memref<8x96xf32, #tpu.memory_space<vmem>>, %arg1: memref<8x4xf32, #tpu.memory_space<vmem>>, %arg2: memref<248x64xf32, #tpu.memory_space<vmem>>, %arg3: memref<8x64xf32, #tpu.memory_space<vmem>>) attributes {dimension_semantics = [], scalar_prefetch = 0 : i64, scratch_operands = 0 : i64, tpu.core_type = #tpu.core_type<tc>} {
    %c0 = arith.constant 0 : index
    %c0_0 = arith.constant 0 : index
    %0 = vector.load %arg2[%c0, %c0_0] : memref<248x64xf32, #tpu.memory_space<vmem>>, vector<96x64xf32>
    %c96 = arith.constant 96 : index
    %c0_1 = arith.constant 0 : index
    %1 = vector.load %arg2[%c96, %c0_1] : memref<248x64xf32, #tpu.memory_space<vmem>>, vector<1x64xf32>
    %c104 = arith.constant 104 : index
    %c0_2 = arith.constant 0 : index
    %2 = vector.load %arg2[%c104, %c0_2] : memref<248x64xf32, #tpu.memory_space<vmem>>, vector<64x64xf32>
    %c168 = arith.constant 168 : index
    %c0_3 = arith.constant 0 : index
    %3 = vector.load %arg2[%c168, %c0_3] : memref<248x64xf32, #tpu.memory_space<vmem>>, vector<1x64xf32>
    %c176 = arith.constant 176 : index
    %c0_4 = arith.constant 0 : index
    %4 = vector.load %arg2[%c176, %c0_4] : memref<248x64xf32, #tpu.memory_space<vmem>>, vector<64x64xf32>
    %c240 = arith.constant 240 : index
    %c0_5 = arith.constant 0 : index
    %5 = vector.load %arg2[%c240, %c0_5] : memref<248x64xf32, #tpu.memory_space<vmem>>, vector<1x64xf32>
    %c0_6 = arith.constant 0 : index
    %c0_7 = arith.constant 0 : index
    %6 = vector.load %arg0[%c0_6, %c0_7] : memref<8x96xf32, #tpu.memory_space<vmem>>, vector<8x96xf32>
    %cst = arith.constant dense<0.000000e+00> : vector<8x64xf32>
    %7 = tpu.matmul %6, %0, %cst {dimension_numbers = #tpu.dot_dimension_numbers<[1], [0], [0], [1], [0, 0, 1, 1], [], []>} : vector<8x96xf32>, vector<96x64xf32>, vector<8x64xf32> -> vector<8x64xf32>
    %8 = vector.broadcast %1 : vector<1x64xf32> to vector<8x64xf32>
    %9 = arith.addf %7, %8 : vector<8x64xf32>
    %cst_8 = arith.constant 0.000000e+00 : f32
    %10 = vector.broadcast %cst_8 : f32 to vector<8x64xf32>
    %11 = arith.maximumf %9, %10 : vector<8x64xf32>
    %cst_9 = arith.constant dense<0.000000e+00> : vector<8x64xf32>
    %12 = tpu.matmul %11, %2, %cst_9 {dimension_numbers = #tpu.dot_dimension_numbers<[1], [0], [0], [1], [0, 0, 1, 1], [], []>} : vector<8x64xf32>, vector<64x64xf32>, vector<8x64xf32> -> vector<8x64xf32>
    %13 = vector.broadcast %3 : vector<1x64xf32> to vector<8x64xf32>
    %14 = arith.addf %12, %13 : vector<8x64xf32>
    %cst_10 = arith.constant 0.000000e+00 : f32
    %15 = vector.broadcast %cst_10 : f32 to vector<8x64xf32>
    %16 = arith.maximumf %14, %15 : vector<8x64xf32>
    %cst_11 = arith.constant dense<0.000000e+00> : vector<8x64xf32>
    %17 = tpu.matmul %16, %4, %cst_11 {dimension_numbers = #tpu.dot_dimension_numbers<[1], [0], [0], [1], [0, 0, 1, 1], [], []>} : vector<8x64xf32>, vector<64x64xf32>, vector<8x64xf32> -> vector<8x64xf32>
    %18 = vector.broadcast %5 : vector<1x64xf32> to vector<8x64xf32>
    %19 = arith.addf %17, %18 : vector<8x64xf32>
    %c0_12 = arith.constant 0 : index
    %c0_13 = arith.constant 0 : index
    %20 = vector.load %arg1[%c0_12, %c0_13] : memref<8x4xf32, #tpu.memory_space<vmem>>, vector<8x4xf32>
    %21 = vector.extract_strided_slice %20 {offsets = [0, 0], sizes = [8, 1], strides = [1, 1]} : vector<8x4xf32> to vector<8x1xf32>
    %22 = vector.broadcast %21 : vector<8x1xf32> to vector<8x64xf32>
    %23 = arith.subf %19, %22 : vector<8x64xf32>
    %24 = math.absf %23 : vector<8x64xf32>
    %25 = vector.extract_strided_slice %24 {offsets = [0, 0], sizes = [8, 1], strides = [1, 1]} : vector<8x64xf32> to vector<8x1xf32>
    %26 = vector.extract_strided_slice %24 {offsets = [0, 1], sizes = [8, 1], strides = [1, 1]} : vector<8x64xf32> to vector<8x1xf32>
    %27 = vector.extract_strided_slice %20 {offsets = [0, 1], sizes = [8, 1], strides = [1, 1]} : vector<8x4xf32> to vector<8x1xf32>
    %28 = vector.extract_strided_slice %20 {offsets = [0, 2], sizes = [8, 1], strides = [1, 1]} : vector<8x4xf32> to vector<8x1xf32>
    %29 = arith.addf %27, %28 : vector<8x1xf32>
    %30 = vector.extract_strided_slice %20 {offsets = [0, 3], sizes = [8, 1], strides = [1, 1]} : vector<8x4xf32> to vector<8x1xf32>
    %31 = arith.addf %29, %30 : vector<8x1xf32>
    %32 = arith.addf %31, %26 : vector<8x1xf32>
    %cst_14 = arith.constant 2.500000e-01 : f32
    %33 = vector.broadcast %cst_14 : f32 to vector<8x1xf32>
    %34 = arith.mulf %32, %33 : vector<8x1xf32>
    %35 = arith.addf %34, %25 : vector<8x1xf32>
    %cst_15 = arith.constant 9.99999993E-9 : f32
    %36 = vector.broadcast %cst_15 : f32 to vector<8x1xf32>
    %37 = arith.addf %35, %36 : vector<8x1xf32>
    %38 = tpu.reciprocal %37 {approx = true} : vector<8x1xf32> -> vector<8x1xf32>
    %39 = arith.mulf %34, %38 : vector<8x1xf32>
    %40 = arith.mulf %25, %39 : vector<8x1xf32>
    %cst_16 = arith.constant 1.000000e-30 : f32
    %41 = vector.broadcast %cst_16 : f32 to vector<8x1xf32>
    %42 = arith.maximumf %26, %41 : vector<8x1xf32>
    %43 = tpu.reciprocal %42 {approx = true} : vector<8x1xf32> -> vector<8x1xf32>
    %cst_17 = arith.constant 0.699999988 : f32
    %44 = vector.broadcast %cst_17 : f32 to vector<8x1xf32>
    %45 = math.powf %43, %44 : vector<8x1xf32>
    %46 = math.tanh %45 : vector<8x1xf32>
    %47 = arith.mulf %46, %26 : vector<8x1xf32>
    %cst_18 = arith.constant 1.000000e+00 : f32
    %48 = vector.broadcast %cst_18 : f32 to vector<8x1xf32>
    %49 = arith.mulf %48, %47 : vector<8x1xf32>
    %50 = arith.addf %40, %49 : vector<8x1xf32>
    %51 = vector.shape_cast %50 : vector<8x1xf32> to vector<1x8x1xf32>
    %cst_19 = arith.constant dense<0.000000e+00> : vector<1xf32>
    %52 = vector.multi_reduction <add>, %51, %cst_19 [1, 2] : vector<1x8x1xf32> to vector<1xf32>
    %53 = vector.shape_cast %52 : vector<1xf32> to vector<1x1x1xf32>
    %54 = vector.extract %53[0, 0, 0] : f32 from vector<1x1x1xf32>
    %55 = vector.broadcast %54 : f32 to vector<1x1xf32>
    %cst_20 = arith.constant 8.000000e+00 : f32
    %56 = vector.broadcast %cst_20 : f32 to vector<1x1xf32>
    %57 = arith.divf %55, %56 : vector<1x1xf32>
    %58 = tpu.iota {dimensions = array<i32: 1>} : vector<8x64xi32>
    %c2_i32 = arith.constant 2 : i32
    %59 = vector.broadcast %c2_i32 : i32 to vector<8x64xi32>
    %60 = arith.cmpi eq, %58, %59 : vector<8x64xi32>
    %61 = vector.shape_cast %57 : vector<1x1xf32> to vector<1x1xf32>
    %62 = vector.broadcast %61 : vector<1x1xf32> to vector<8x64xf32>
    %63 = arith.select %60, %62, %19 : vector<8x64xi1>, vector<8x64xf32>
    %c0_21 = arith.constant 0 : index
    %c0_22 = arith.constant 0 : index
    %64 = vector.load %arg3[%c0_21, %c0_22] : memref<8x64xf32, #tpu.memory_space<vmem>>, vector<8x64xf32>
    tpu.vector_store %arg3[%c0_21, %c0_22], %63 {strides = array<i32>} : memref<8x64xf32, #tpu.memory_space<vmem>>, vector<8x64xf32>,
    return
  }
}

</mosaic_0001>

<bundles_post_ra>
// kernel: tpu_custom_call.1
= control target key start
LH: loop header
LB: loop body
LE: loop exit
PB: predicated region body
PF: predicated region fallthrough
CT: control target
= control target key end

     0   :  { %s488_s0 = inlined_call_operand.vmem [shape: f32[8,96], index: 0, kind: input, shape index: {}]   ;;  %s489_s1 = inlined_call_operand.vmem [shape: f32[8,4], index: 1, kind: input, shape index: {}]   ;;  %s490_s2 = inlined_call_operand.vmem [shape: f32[248,64], index: 2, kind: input, shape index: {}]   ;;  %s491_s3 = inlined_call_operand.hbm [shape: f32[8,64], index: 3, kind: output, shape index: {}]  }
   0x1   :  { %v26_v0 = vld [vmem:[%s490_s2 + $0x58] sm:$0xff]  ;;  %v25_v1 = vld [vmem:[%s490_s2 + $0x50] sm:$0xff]  ;;  %v24_v2 = vld [vmem:[%s490_s2 + $0x48] sm:$0xff] }
   0x2   :  { %56 = vmatpush.msra.mxu0 %v26_v0  ;;  %v23_v3 = vld [vmem:[%s490_s2 + $0x40] sm:$0xff]  ;;  %v34_v5 = vld [vmem:[%s490_s2 + $0x98] sm:$0xff]  ;;  %v33_v7 = vld [vmem:[%s490_s2 + $0x90] sm:$0xff] }
   0x3   :  { %v35_v4 = vld [vmem:[%s490_s2 + $0xa0] sm:$0xff]  ;;  %v22_v6 = vld [vmem:[%s490_s2 + $0x38] sm:$0xff] }
   0x4   :  { %57 = vmatpush.msra.mxu0 %v25_v1  ;;  %86 = vmatpush.msra.mxu1 %v35_v4 }
   0x6   :  { %58 = vmatpush.msra.mxu0 %v24_v2  ;;  %87 = vmatpush.msra.mxu1 %v34_v5 }
   0x8   :  { %59 = vmatpush.msra.mxu0 %v23_v3 }
   0x9   :  { %8 = vsyncpa [#allocation3], 0  ;;  %v21_v8 = vld [vmem:[%s490_s2 + $0x30] sm:$0xff]  ;;  %v32_v9 = vld [vmem:[%s490_s2 + $0x88] sm:$0xff]  ;;  %88 = vmatpush.msra.mxu1 %v33_v7  ;;  %vm48_vm0 = vcmask 785408   ;;  %vm74_vm1 = vcmask 523264  }
   0xa   :  { %60 = vmatpush.msra.mxu0 %v22_v6  ;;  %v20_v10 = vld [vmem:[%s490_s2 + $0x28] sm:$0xff]  ;;  %v31_v11 = vld [vmem:[%s490_s2 + $0x80] sm:$0xff]  ;;  %v18_v13 = vld [vmem:[%s490_s2 + $0x18] sm:$0xff]  ;;  %v327_v34 = vmov 0   ;;  %s328_s19 = smov 126   ;;  %s329_s20 = smov 127  }
   0xb   :  { %89 = vmatpush.msra.mxu1 %v32_v9  ;;  %v19_v12 = vld [vmem:[%s490_s2 + $0x20] sm:$0xff]  ;;  %v17_v14 = vld [vmem:[%s490_s2 + $0x10] sm:$0xff]  ;;  %v16_v15 = vld [vmem:[%s490_s2 + $0x8] sm:$0xff]  ;;  %287 = vset.pattern.permute.xlu0 %v327_v34  ;;  %s330_s24 = smov 1   ;;  %vm164_vm12 = vcmask 7168   ;;  %s196_s28 = sshll.u32 %s491_s3, 4  ;;  %s197_s28 = int_to_ptr.hbm [resolvable:$true] %s196_s28 }
   0xc   :  { %61 = vmatpush.msra.mxu0 %v21_v8  ;;  %v15_v16 = vld [vmem:[%s490_s2] sm:$0xff]  ;;  %v30_v18 = vld [vmem:[%s490_s2 + $0x78] sm:$0xff]  ;;  %v29_v19 = vld [vmem:[%s490_s2 + $0x70] sm:$0xff] }
   0xd   :  { %90 = vmatpush.msra.mxu1 %v31_v11  ;;  %v46_v17 = vld [vmem:[%s488_s0] sm:$0xff]  ;;  %v28_v20 = vld [vmem:[%s490_s2 + $0x68] sm:$0xff]  ;;  %v42_v23 = vld [vmem:[%s490_s2 + $0xd8] sm:$0xff] }
   0xe   :  { %62 = vmatpush.msra.mxu0 %v20_v10  ;;  %v44_v21 = vld [vmem:[%s490_s2 + $0xe8] sm:$0xff]  ;;  %v43_v22 = vld [vmem:[%s490_s2 + $0xe0] sm:$0xff]  ;;  %v41_v24 = vld [vmem:[%s490_s2 + $0xd0] sm:$0xff] }
   0xf   :  { %91 = vmatpush.msra.mxu1 %v30_v18  ;;  %111 = vmatpush.msra.mxu2 %v44_v21  ;;  %v40_v25 = vld [vmem:[%s490_s2 + $0xc8] sm:$0xff]  ;;  %v288_v26 = vld [vmem:[%s490_s2 + $0x60] ss:$0 sm:$0xff]  ;;  %v38_v31 = vld [vmem:[%s490_s2 + $0xb8] sm:$0xff] }
  0x10   :  { %63 = vmatpush.msra.mxu0 %v19_v12  ;;  %v39_v30 = vld [vmem:[%s490_s2 + $0xc0] sm:$0xff]  ;;  %v37_v32 = vld [vmem:[%s490_s2 + $0xb0] sm:$0xff]  ;;  %v289_v35 = vld [vmem:[%s490_s2 + $0xa8] ss:$0 sm:$0xff] }
  0x11   :  { %92 = vmatpush.msra.mxu1 %v29_v19  ;;  %112 = vmatpush.msra.mxu2 %v43_v22  ;;  %v447_v33 = vld [vmem:[%s489_s1] sm:$0xff]  ;;  %v290_v39 = vld [vmem:[%s490_s2 + $0xf0] ss:$0 sm:$0xff]  ;;  %s332_s2 = smov [#allocation2]  }
  0x12   :  { %64 = vmatpush.msra.mxu0 %v18_v13  ;;  %135 = vrot.lane.b32.xlu1 %v447_v33, %s328_s19  ;;  %s194_s25 = sshll.u32 %s332_s2, 4  ;;  %s195_s25 = int_to_ptr.vmem [resolvable:$true] %s194_s25 }
  0x13   :  { %93 = vmatpush.msra.mxu1 %v28_v20  ;;  %113 = vmatpush.msra.mxu2 %v42_v23 }
  0x14   :  { %65 = vmatpush.msra.mxu0 %v17_v14  ;;  %126 = vperm.xlu0 %287, %v447_v33  }
  0x15   :  { %114 = vmatpush.msra.mxu2 %v41_v24 }
  0x16   :  { %66 = vmatpush.msra.mxu0 %v16_v15 }
  0x17   :  { %115 = vmatpush.msra.mxu2 %v40_v25 }
  0x18   :  { %67 = vmatpush.msra.mxu0 %v15_v16 }
  0x19   :  { %205 = vmatmul.msk.f32.vlgmr.msra.gmra.mxu0 %vm48_vm0, %v46_v17  ;;  %116 = vmatpush.msra.mxu2 %v39_v30 }
  0x1b   :  { %117 = vmatpush.msra.mxu2 %v38_v31 }
  0x1c   :  { %131 = vrot.lane.b32.xlu0 %v447_v33, %s329_s20 }
  0x1d   :  { %118 = vmatpush.msra.mxu2 %v37_v32 }
  0x84   :  { %v136_v23 = vpop.permute.xlu1 %135 }
  0x86   :  { %v127_v42 = vpop.permute.xlu0 %126 }
  0x8e   :  { %v132_v21 = vpop.permute.xlu0 %131 }
  0x8f   :  { %v134_v22 = vadd.f32 %v132_v21, %v447_v33 }
  0x91   :  { %v138_v24 = vadd.f32 %v136_v23, %v134_v22 }
  0x96   :  { %v69_v27 = vpop.f32.mrf.mxu0 }
  0x97   :  { %v70_v28 = vadd.f32 %v288_v26, %v69_v27 }
  0x99   :  { %v72_v29 = vmax.f32 %v70_v28, 0.0 }
  0x9b   :  { %206 = vmatmul.msk.f32.vlgmr.msra.gmra.mxu1 %vm74_vm1, %v72_v29 }
 0x118   :  { %v95_v36 = vpop.f32.mrf.mxu1 }
 0x119   :  { %v96_v37 = vadd.f32 %v289_v35, %v95_v36 }
 0x11b   :  { %v98_v38 = vmax.f32 %v96_v37, 0.0 }
 0x11d   :  { %207 = vmatmul.msk.f32.vlgmr.msra.gmra.mxu2 %vm74_vm1, %v98_v38 }
 0x1a0   :  { %v120_v40 = vpop.f32.mrf.mxu2 }
 0x1a1   :  { %v460_v41 = vadd.f32 %v290_v39, %v120_v40 }
 0x1a3   :  { %v129_v43 = vsub.f32 %v460_v41, %v127_v42 }
 0x1a5   :  { %v463_v44 = vand.u32 2147483647, %v129_v43 }
 0x1a7   :  { %v154_v45 = vmax.f32 %v463_v44, 1e-30  ;;  %142 = vrot.lane.b32.xlu1 %v463_v44, %s330_s24  ;;  %v139_v26 = vadd.f32 %v138_v24, %v463_v44 }
 0x1a9   :  { %291 = vrcp.f32 %v154_v45  ;;  %v140_v28 = vmul.f32 0.25, %v139_v26 }
 0x1af   :  { %v467_v46 = vpop.eup %291 }
 0x1b0   :  { %v212_v47 = vand.u32 2147483647, %v467_v46  ;;  %vm259_vm7 = vcmp.lt.f32.partialorder %v467_v46, 0  ;;  %vm260_vm8 = vcmp.eq.f32.partialorder %v467_v46, 0  ;;  %vm272_vm10 = vcmp.ne.f32.partialorder %v467_v46, %v467_v46 }
 0x1b1   :  { %vm261_vm11 = vcmp.eq.f32.partialorder %v467_v46, 1065353216 }
 0x1b2   :  { %v218_v48 = vand.u32 8388607, %v212_v47  ;;  %v214_v1 = vand.u32 2139095040, %v212_v47  ;;  %vm252_vm3 = vweird.f32 %v212_v47  ;;  %vm251_vm4 = vcmp.lt.f32.partialorder %v212_v47, 0.0 }
 0x1b3   :  { %vm250_vm5 = vcmp.eq.f32.partialorder %v212_v47, 0.0  ;;  %vm249_vm6 = vcmp.eq.f32.partialorder %v212_v47, 1.0  ;;  %vm264_vm9 = vcmp.eq.f32.partialorder %v212_v47, 2139095040 }
 0x1b4   :  { %v219_v49 = vor.u32 8388608, %v218_v48  ;;  %v215_v4 = vshrl.u32 %v214_v1, 23 }
 0x1b6   :  { %v221_v50 = vand.u32 8388607, %v219_v49  ;;  %v277_v7 = vadd.s32 4294967169, %v215_v4 }
 0x1b8   :  { %v222_v51 = vor.u32 1065353216, %v221_v50  ;;  %v226_v10 = vadd.s32 1, %v277_v7 }
 0x1ba   :  { %v224_v52 = vmul.f32 0.5, %v222_v51  ;;  %vm223_vm2 = vcmp.ge.f32.partialorder %v222_v51, 1.4142135 }
 0x1bb   :  { %v227_v12 = vsel %vm223_vm2, %v226_v10, %v277_v7 }
 0x1bc   :  { %v225_v53 = vsel %vm223_vm2, %v224_v52, %v222_v51  ;;  %v247_v14 = vcvt.s32.f32 %v227_v12 }
 0x1bd   :  { %v278_v54 = vadd.f32 -1.0, %v225_v53 }
 0x1bf   :  { %v229_v55 = vmul.f32 %v278_v54, %v278_v54 }
 0x1c1   :  { %v230_v56 = vmul.f32 0.12621109, %v229_v55  ;;  %v232_v58 = vmul.f32 -0.20706727, %v229_v55 }
 0x1c3   :  { %v231_v57 = vadd.f32 0.21545328, %v230_v56  ;;  %v233_v60 = vadd.f32 -0.23896284, %v232_v58 }
 0x1c5   :  { %v234_v59 = vmul.f32 %v231_v57, %v229_v55  ;;  %v236_v62 = vmul.f32 %v233_v60, %v229_v55 }
 0x1c7   :  { %v235_v61 = vadd.f32 0.28795174, %v234_v59  ;;  %v237_v0 = vadd.f32 -0.3607037, %v236_v62 }
 0x1c9   :  { %v238_v63 = vmul.f32 %v235_v61, %v229_v55  ;;  %v240_v3 = vmul.f32 %v237_v0, %v229_v55 }
 0x1cb   :  { %v239_v2 = vadd.f32 0.48090908, %v238_v63  ;;  %v241_v6 = vadd.f32 -0.72134733, %v240_v3 }
 0x1cd   :  { %v242_v5 = vmul.f32 %v239_v2, %v229_v55  ;;  %v244_v9 = vmul.f32 %v278_v54, %v241_v6 }
 0x1cf   :  { %v243_v8 = vadd.f32 1.442695, %v242_v5 }
 0x1d1   :  { %v245_v11 = vadd.f32 %v244_v9, %v243_v8 }
 0x1d3   :  { %v246_v13 = vmul.f32 %v278_v54, %v245_v11  ;;  %v331_v54 = vmov 8.0  }
 0x1d5   :  { %v248_v15 = vadd.f32 %v247_v14, %v246_v13 }
 0x1d7   :  { %v253_v16 = vsel %vm252_vm3, %v212_v47, %v248_v15 }
 0x1d8   :  { %v254_v17 = vsel %vm251_vm4, nan, %v253_v16 }
 0x1d9   :  { %v255_v18 = vsel %vm250_vm5, -inf, %v254_v17 }
 0x1da   :  { %v256_v19 = vsel %vm249_vm6, 0.0, %v255_v18 }
 0x1db   :  { %v257_v20 = vmul.f32 0.7, %v256_v19 }
 0x1dd   :  { %293 = vpow2.f32 %v257_v20 }
 0x1e3   :  { %v294_v25 = vpop.eup %293 }
 0x1e4   :  { %v265_v27 = vsel %vm259_vm7, 2143289344, %v294_v25 }
 0x1e5   :  { %v266_v29 = vsel %vm260_vm8, 0, %v265_v27 }
 0x1e6   :  { %v271_v32 = vsel %vm264_vm9, 2139095040, %v266_v29 }
 0x1e7   :  { %v275_v33 = vsel %vm272_vm10, 2143289344, %v271_v32 }
 0x1e8   :  { %v276_v35 = vsel %vm261_vm11, 1065353216, %v275_v33 }
 0x219   :  { %v143_v30 = vpop.permute.xlu1 %142 }
 0x21a   :  { %v145_v31 = vadd.f32 %v143_v30, %v140_v28 }
 0x21c   :  { %v146_v34 = vadd.f32 1e-08, %v145_v31 }
 0x21e   :  { %295 = vrcp.f32 %v146_v34 }
 0x21f   :  { %297 = vtanh.f32 %v276_v35 }
 0x220   :  { %299 = vrcp.f32 %v331_v54 }
 0x224   :  { %v296_v36 = vpop.eup %295 }
 0x225   :  { %v148_v37 = vmul.f32 %v296_v36, %v140_v28  ;;  %v298_v38 = vpop.eup %297 }
 0x226   :  { %v158_v39 = vmul.f32 %v298_v38, %v463_v44  ;;  %v300_v55 = vpop.eup %299 }
 0x227   :  { %150 = vrot.lane.b32.xlu2 %v148_v37, %s329_s20  ;;  %v177_v56 = vmul.f32 8.0, %v300_v55  ;;  %vm181_vm13 = vweird.f32 %v300_v55 }
 0x229   :  { %v178_v57 = vsub.f32 1.0, %v177_v56 }
 0x22b   :  { %v179_v58 = vmul.f32 %v300_v55, %v178_v57 }
 0x22d   :  { %v180_v59 = vadd.f32 %v300_v55, %v179_v58 }
 0x22f   :  { %160 = vrot.lane.b32.xlu2 %v158_v39, %s329_s20  ;;  %v182_v61 = vsel %vm181_vm13, %v300_v55, %v180_v59 }
 0x281   :  { %v151_v40 = vpop.permute.xlu2 %150 }
 0x282   :  { %v153_v42 = vmul.f32 %v151_v40, %v463_v44  ;;  %v184_v44 = vlaneseq }
 0x284   :  { %v185_v60 = vand.u32 127, %v184_v44 }
 0x286   :  { %vm186_vm14 = vcmp.eq.s32.totalorder %v185_v60, 2 }
 0x289   :  { %v161_v43 = vpop.permute.xlu2 %160 }
 0x28a   :  { %v163_v45 = vadd.f32 %v161_v43, %v153_v42 }
 0x28c   :  { %v165_v47 = vsel %vm164_vm12, %v163_v45, 0.0 }
 0x28d   :  { %166 = vadd.xlane.f32.xlu0 %v165_v47 }
 0x300   :  { %v167_v46 = vpop.xlane.xlu0 %166 }
 0x301   :  { %v168_v48 = vrot.slane %v167_v46, 4 }
 0x303   :  { %v169_v49 = vadd.f32 %v168_v48, %v167_v46 }
 0x305   :  { %v170_v50 = vrot.slane %v169_v49, 2 }
 0x307   :  { %v171_v51 = vadd.f32 %v170_v50, %v169_v49 }
 0x309   :  { %v172_v52 = vrot.slane %v171_v51, 1 }
 0x30b   :  { %v173_v53 = vadd.f32 %v172_v52, %v171_v51 }
 0x30d   :  { %279 = vpush %v173_v53 }
 0x33e   :  { %s280_s26 = spop %279 }
 0x33f   :  { %v175_v62 = vstv %s280_s26 }
 0x340   :  { %v183_v63 = vmul.f32 %v182_v61, %v175_v62 }
 0x342   :  { %v187_v0 = vsel %vm186_vm14, %v183_v63, %v460_v41 }
 0x343   :  { %188 = vst.msk [vmem:[#allocation2] sm:$0xff] %vm74_vm1, %v187_v0 }
 0x344   :  { %199 = dma.vmem_to_hbm [thread:$0]  %s195_s25, 128, %s197_s28, [#allocation3]  }
 0x345   :  { %325 = dma.done.wait [#allocation3], 128  }
 0x346   :  { %326 = vsyncadd [#allocation3], 4294967168 }
 0x347   :  { %204 = vsyncpa [#allocation3], 1 }

</bundles_post_ra>
